<compile_context>
chip_gen: v7x
topology: tpu7x:2x2x1
jax: 0.10.0
libtpu: 0.0.40
codegen_flags: <defaults>
</compile_context>

<pallas_src>
import functools
import math

import jax
import jax.numpy as jnp
from jax import lax
from jax.experimental import pallas as pl
from jax.experimental.pallas import tpu as pltpu

LN_EPS = 1e-12  # DistilBERT LayerNorm eps


@functools.lru_cache(maxsize=None)
def _vmem_limit_bytes():
    # Per-generation scoped-VMEM budget: v5e/v6e -> ~96 MiB of their 128 MiB,
    # v7x -> ~48 MiB of its 64 MiB.  (3/4 of physical, capped at 100 MiB.)
    try:
        cap = int(pltpu.get_tpu_info().vmem_capacity_bytes)
    except Exception:
        cap = 64 * 1024 * 1024
    return int(min(cap * 3 // 4, 100 * 1024 * 1024))


def _compiler_params():
    return pltpu.CompilerParams(
        dimension_semantics=("parallel",),
        vmem_limit_bytes=_vmem_limit_bytes())


# ----------------------------- Pallas kernels ----------------------------- #

def _layernorm_kernel(x_ref, g_ref, b_ref, o_ref):
    x = x_ref[...].astype(jnp.float32)
    mu = jnp.mean(x, axis=-1, keepdims=True)
    var = jnp.mean(jnp.square(x - mu), axis=-1, keepdims=True)
    o_ref[...] = ((x - mu) * lax.rsqrt(var + LN_EPS) * g_ref[...]
                  + b_ref[...]).astype(o_ref.dtype)


def _encoder_layer_kernel(h_ref, mask_ref, mcol_ref,
                          wqkv_ref, bqkv_ref, wo_ref, bo_ref,
                          ln1g_ref, ln1b_ref, w1_ref, b1_ref,
                          w2_ref, b2_ref, ln2g_ref, ln2b_ref,
                          o_ref, *, n_heads, pool):
    """One full DistilBERT encoder layer for one batch, entirely in VMEM."""
    S, H = h_ref.shape
    Dh = H // n_heads
    scale = 1.0 / math.sqrt(Dh)

    h_bf = h_ref[...]                                     # (S, H) bf16
    key_mask = mask_ref[...].reshape(1, S)                # (1, S) f32, 1 = keep

    # --- fused QKV projection: single MXU pass, one f32->bf16 cast ---------
    qkv = (jnp.dot(h_bf, wqkv_ref[...], preferred_element_type=jnp.float32)
           + bqkv_ref[...]).astype(jnp.bfloat16)          # (S, 3H)

    # --- multi-head attention; Wo projection is fused into the head loop so
    #     the (S, H) context slab is never materialized / concatenated.
    # TODO(synk): head slices are Dh-wide on the lane axis (< 128); a
    # head-major / padded layout would make them lane-aligned at real sizes.
    attn = jnp.zeros((S, H), jnp.float32)
    neg = jnp.float32(-1e30)
    for hd in range(n_heads):
        q = qkv[:, hd * Dh:(hd + 1) * Dh]                 # bf16 (S, Dh)
        k = qkv[:, H + hd * Dh:H + (hd + 1) * Dh]
        v = qkv[:, 2 * H + hd * Dh:2 * H + (hd + 1) * Dh]
        # contract on Dh directly -> no materialized k.T
        s = lax.dot_general(q, k, (((1,), (1,)), ((), ())),
                            preferred_element_type=jnp.float32) * scale
        s = jnp.where(key_mask > 0.0, s, neg)
        s = s - jnp.max(s, axis=-1, keepdims=True)
        p = jnp.exp(s)
        p = p / jnp.sum(p, axis=-1, keepdims=True)
        ctx = jnp.dot(p.astype(jnp.bfloat16), v,
                      preferred_element_type=jnp.float32)  # (S, Dh)
        # fold this head's context straight into the output projection
        attn = attn + jnp.dot(ctx.astype(jnp.bfloat16),
                              wo_ref[hd * Dh:(hd + 1) * Dh, :],
                              preferred_element_type=jnp.float32)

    # --- attention-out bias + residual + LayerNorm 1 (f32) -----------------
    z = attn + bo_ref[...] + h_bf.astype(jnp.float32)
    mu = jnp.mean(z, axis=-1, keepdims=True)
    var = jnp.mean(jnp.square(z - mu), axis=-1, keepdims=True)
    sa = (z - mu) * lax.rsqrt(var + LN_EPS) * ln1g_ref[...] + ln1b_ref[...]

    # --- FFN-1 + GELU -------------------------------------------------------
    ff = (jnp.dot(sa.astype(jnp.bfloat16), w1_ref[...],
                  preferred_element_type=jnp.float32) + b1_ref[...])
    # TODO(synk): HF DistilBERT uses exact erf-GELU; tanh approximation here.
    ff = jax.nn.gelu(ff, approximate=True)

    # --- FFN-2 + residual (f32, no bf16 round-trip) + LayerNorm 2 -----------
    y = (jnp.dot(ff.astype(jnp.bfloat16), w2_ref[...],
                 preferred_element_type=jnp.float32) + b2_ref[...] + sa)
    mu2 = jnp.mean(y, axis=-1, keepdims=True)
    var2 = jnp.mean(jnp.square(y - mu2), axis=-1, keepdims=True)
    out = (y - mu2) * lax.rsqrt(var2 + LN_EPS) * ln2g_ref[...] + ln2b_ref[...]

    if pool:
        # last layer: masked mean-pool, emit one (1, H) f32 row per batch
        m = mcol_ref[...]                                       # (S, 1) f32
        summed = jnp.sum(out * m, axis=0, keepdims=True)        # (1, H)
        cnt = jnp.maximum(jnp.sum(m, axis=0, keepdims=True), 1e-9)
        o_ref[...] = (summed / cnt).reshape(o_ref.shape).astype(o_ref.dtype)
    else:
        o_ref[...] = out.astype(o_ref.dtype)


# ------------------------------ Pallas wrappers ---------------------------- #

def embedding_layernorm(x, g, b, B, S):
    """LayerNorm of the (B*S, H) embedding sum; grid over batches."""
    M, H = x.shape
    return pl.pallas_call(
        _layernorm_kernel,
        out_shape=jax.ShapeDtypeStruct((M, H), jnp.bfloat16),
        grid=(B,),
        in_specs=[pl.BlockSpec((S, H), lambda i: (i, 0)),
                  pl.BlockSpec((1, H), lambda i: (0, 0)),
                  pl.BlockSpec((1, H), lambda i: (0, 0))],
        out_specs=pl.BlockSpec((S, H), lambda i: (i, 0)),
        compiler_params=_compiler_params(),
        cost_estimate=pl.CostEstimate(
            flops=8 * M * H, transcendentals=M,
            bytes_accessed=4 * M * H + 2 * M * H + 8 * H),
    )(x, g, b)


def encoder_layer(h, mask_bsl, mask_col, lp, n_heads, *, pool=False):
    """One fully-fused DistilBERT encoder layer (optionally + mean pooling)."""
    M, H = h.shape
    B = mask_bsl.shape[0]
    S = M // B
    F = lp['w1'].shape[1]

    in_specs = [
        pl.BlockSpec((S, H), lambda b: (b, 0)),          # hidden state
        pl.BlockSpec((1, 1, S), lambda b: (b, 0, 0)),    # key mask
        pl.BlockSpec((S, 1), lambda b: (b, 0)),          # pooling mask
        pl.BlockSpec((H, 3 * H), lambda b: (0, 0)),      # wqkv
        pl.BlockSpec((1, 3 * H), lambda b: (0, 0)),      # bqkv
        pl.BlockSpec((H, H), lambda b: (0, 0)),          # wo
        pl.BlockSpec((1, H), lambda b: (0, 0)),          # bo
        pl.BlockSpec((1, H), lambda b: (0, 0)),          # ln1_g
        pl.BlockSpec((1, H), lambda b: (0, 0)),          # ln1_b
        pl.BlockSpec((H, F), lambda b: (0, 0)),          # w1
        pl.BlockSpec((1, F), lambda b: (0, 0)),          # b1
        pl.BlockSpec((F, H), lambda b: (0, 0)),          # w2
        pl.BlockSpec((1, H), lambda b: (0, 0)),          # b2
        pl.BlockSpec((1, H), lambda b: (0, 0)),          # ln2_g
        pl.BlockSpec((1, H), lambda b: (0, 0)),          # ln2_b
    ]
    if pool:
        out_shape = jax.ShapeDtypeStruct((B, 1, H), jnp.float32)
        out_specs = pl.BlockSpec((1, 1, H), lambda b: (b, 0, 0))
        out_bytes = 4 * B * H
    else:
        out_shape = jax.ShapeDtypeStruct((M, H), jnp.bfloat16)
        out_specs = pl.BlockSpec((S, H), lambda b: (b, 0))
        out_bytes = 2 * M * H

    flops = 2 * M * H * (3 * H + 2 * S + H + 2 * F)
    transcendentals = B * n_heads * S * S + M * F + 2 * M
    bytes_accessed = (2 * M * H + 4 * B * S + 4 * M
                      + 2 * (3 * H * H + H * H + 2 * H * F)
                      + 4 * (3 * H + 6 * H + F) + out_bytes)

    out = pl.pallas_call(
        functools.partial(_encoder_layer_kernel, n_heads=n_heads, pool=pool),
        out_shape=out_shape,
        grid=(B,),
        in_specs=in_specs,
        out_specs=out_specs,
        compiler_params=_compiler_params(),
        cost_estimate=pl.CostEstimate(flops=flops,
                                      transcendentals=transcendentals,
                                      bytes_accessed=bytes_accessed),
    )(h, mask_bsl, mask_col,
      lp['wqkv'], lp['bqkv'], lp['wo'], lp['bo'], lp['ln1_g'], lp['ln1_b'],
      lp['w1'], lp['b1'], lp['w2'], lp['b2'], lp['ln2_g'], lp['ln2_b'])

    if pool:
        return out.reshape(B, H)
    return out


# --------------------------- synthetic DistilBERT -------------------------- #

def init_params(key, vocab=100, max_pos=64, hidden=128, n_heads=4, ffn=256,
                n_layers=2):
    def nrm(k, shape):
        return jax.random.normal(k, shape, jnp.float32) * 0.02

    keys = jax.random.split(key, 2 + n_layers)
    params = {
        'word_emb': nrm(keys[0], (vocab, hidden)),
        'pos_emb': nrm(keys[1], (max_pos, hidden)),
        'emb_ln_g': jnp.ones((1, hidden), jnp.float32),
        'emb_ln_b': jnp.zeros((1, hidden), jnp.float32),
        'n_heads': n_heads,
        'layers': [],
    }
    for i in range(n_layers):
        lk = jax.random.split(keys[2 + i], 6)
        wq, wk, wv = (nrm(lk[j], (hidden, hidden)) for j in range(3))
        params['layers'].append({
            # fused QKV projection: one (H, 3H) bf16 weight -> single MXU pass
            'wqkv': jnp.concatenate([wq, wk, wv], axis=1).astype(jnp.bfloat16),
            'bqkv': jnp.zeros((1, 3 * hidden), jnp.float32),
            'wo': nrm(lk[3], (hidden, hidden)).astype(jnp.bfloat16),
            'bo': jnp.zeros((1, hidden), jnp.float32),
            'w1': nrm(lk[4], (hidden, ffn)).astype(jnp.bfloat16),
            'b1': jnp.zeros((1, ffn), jnp.float32),
            'w2': nrm(lk[5], (ffn, hidden)).astype(jnp.bfloat16),
            'b2': jnp.zeros((1, hidden), jnp.float32),
            'ln1_g': jnp.ones((1, hidden), jnp.float32),
            'ln1_b': jnp.zeros((1, hidden), jnp.float32),
            'ln2_g': jnp.ones((1, hidden), jnp.float32),
            'ln2_b': jnp.zeros((1, hidden), jnp.float32),
        })
    return params


def distilbert_sentence_embed(params, input_ids, attention_mask):
    # TODO(synk): the HF tokenizer (text -> ids) has no Pallas equivalent;
    # precomputed input_ids / attention_mask are taken as inputs instead.
    B, S = input_ids.shape
    assert S % 8 == 0, "sequence length must be padded to a multiple of 8"
    H = params['word_emb'].shape[1]
    n_heads = params['n_heads']
    M = B * S

    # TODO(synk): embedding gather + position add kept as XLA glue; a
    # scalar-prefetch pl.Element row-gather kernel would fuse it with the LN.
    pos_ids = jnp.arange(S, dtype=jnp.int32)
    x = (jnp.take(params['word_emb'], input_ids, axis=0)
         + jnp.take(params['pos_emb'], pos_ids, axis=0)[None, :, :])
    h = embedding_layernorm(x.reshape(M, H), params['emb_ln_g'],
                            params['emb_ln_b'], B, S)

    mask_f = attention_mask.astype(jnp.float32)
    mask_bsl = mask_f.reshape(B, 1, S)     # key mask for attention
    mask_col = mask_f.reshape(M, 1)        # per-token mask for pooling

    n_layers = len(params['layers'])
    pooled = None
    for li, lp in enumerate(params['layers']):
        last = (li + 1 == n_layers)
        res = encoder_layer(h, mask_bsl, mask_col, lp, n_heads, pool=last)
        if last:
            pooled = res                     # (B, H) f32
        else:
            h = res                          # (M, H) bf16
    return pooled


# ----------------------------------- main ---------------------------------- #

if __name__ == "__main__":
    key = jax.random.PRNGKey(0)
    pkey, ikey = jax.random.split(key)

    B, S, H, NH, FFN, LAYERS = 2, 16, 128, 4, 256, 2
    params = init_params(pkey, vocab=100, max_pos=64, hidden=H, n_heads=NH,
                         ffn=FFN, n_layers=LAYERS)

    input_ids = jax.random.randint(ikey, (B, S), 0, 100, dtype=jnp.int32)
    lengths = jnp.array([16, 11], dtype=jnp.int32)   # second sentence is padded
    attention_mask = (jnp.arange(S)[None, :] < lengths[:, None]).astype(jnp.int32)

    out = distilbert_sentence_embed(params, input_ids, attention_mask)
    out = jax.block_until_ready(out)

    assert out.shape == (B, H), out.shape
    assert bool(jnp.all(jnp.isfinite(out)))
    print("KERNEL_OK")
</pallas_src>

<mosaic_0001>
module attributes {stable_mosaic.version = 11 : i64} {
  func.func @_layernorm_kernel(%arg0: i32, %arg1: memref<16x128xf32, #tpu.memory_space<vmem>>, %arg2: memref<1x128xf32, #tpu.memory_space<vmem>>, %arg3: memref<1x128xf32, #tpu.memory_space<vmem>>, %arg4: memref<16x128xbf16, #tpu.memory_space<vmem>>) attributes {dimension_semantics = [#tpu.dimension_semantics<parallel>], iteration_bounds = array<i64: 2>, scalar_prefetch = 0 : i64, scratch_operands = 0 : i64, tpu.core_type = #tpu.core_type<tc>, window_params = [{transform_indices = @transform_0, window_bounds = array<i64: 16, 128>}, {pipeline_mode = #tpu.pipeline_mode<synchronous>, transform_indices = @transform_1, window_bounds = array<i64: 1, 128>}, {pipeline_mode = #tpu.pipeline_mode<synchronous>, transform_indices = @transform_2, window_bounds = array<i64: 1, 128>}, {transform_indices = @transform_3, window_bounds = array<i64: 16, 128>}]} {
    %c0 = arith.constant 0 : index
    %c0_0 = arith.constant 0 : index
    %0 = vector.load %arg1[%c0, %c0_0] : memref<16x128xf32, #tpu.memory_space<vmem>>, vector<16x128xf32>
    %cst = arith.constant dense<0.000000e+00> : vector<16xf32>
    %1 = vector.multi_reduction <add>, %0, %cst [1] : vector<16x128xf32> to vector<16xf32>
    %2 = vector.shape_cast %1 : vector<16xf32> to vector<16x1xf32>
    %cst_1 = arith.constant 1.280000e+02 : f32
    %3 = vector.broadcast %cst_1 : f32 to vector<16x1xf32>
    %4 = arith.divf %2, %3 : vector<16x1xf32>
    %5 = vector.broadcast %4 : vector<16x1xf32> to vector<16x128xf32>
    %6 = arith.subf %0, %5 : vector<16x128xf32>
    %7 = arith.mulf %6, %6 : vector<16x128xf32>
    %cst_2 = arith.constant dense<0.000000e+00> : vector<16xf32>
    %8 = vector.multi_reduction <add>, %7, %cst_2 [1] : vector<16x128xf32> to vector<16xf32>
    %9 = vector.shape_cast %8 : vector<16xf32> to vector<16x1xf32>
    %cst_3 = arith.constant 1.280000e+02 : f32
    %10 = vector.broadcast %cst_3 : f32 to vector<16x1xf32>
    %11 = arith.divf %9, %10 : vector<16x1xf32>
    %12 = vector.broadcast %4 : vector<16x1xf32> to vector<16x128xf32>
    %13 = arith.subf %0, %12 : vector<16x128xf32>
    %cst_4 = arith.constant 9.99999996E-13 : f32
    %14 = vector.broadcast %cst_4 : f32 to vector<16x1xf32>
    %15 = arith.addf %11, %14 : vector<16x1xf32>
    %16 = math.rsqrt %15 : vector<16x1xf32>
    %17 = vector.broadcast %16 : vector<16x1xf32> to vector<16x128xf32>
    %18 = arith.mulf %13, %17 : vector<16x128xf32>
    %c0_5 = arith.constant 0 : index
    %c0_6 = arith.constant 0 : index
    %19 = vector.load %arg2[%c0_5, %c0_6] : memref<1x128xf32, #tpu.memory_space<vmem>>, vector<1x128xf32>
    %20 = vector.broadcast %19 : vector<1x128xf32> to vector<16x128xf32>
    %21 = arith.mulf %18, %20 : vector<16x128xf32>
    %c0_7 = arith.constant 0 : index
    %c0_8 = arith.constant 0 : index
    %22 = vector.load %arg3[%c0_7, %c0_8] : memref<1x128xf32, #tpu.memory_space<vmem>>, vector<1x128xf32>
    %23 = vector.broadcast %22 : vector<1x128xf32> to vector<16x128xf32>
    %24 = arith.addf %21, %23 : vector<16x128xf32>
    %25 = arith.truncf %24 : vector<16x128xf32> to vector<16x128xbf16>
    %c0_9 = arith.constant 0 : index
    %c0_10 = arith.constant 0 : index
    %26 = vector.load %arg4[%c0_9, %c0_10] : memref<16x128xbf16, #tpu.memory_space<vmem>>, vector<16x128xbf16>
    tpu.vector_store %arg4[%c0_9, %c0_10], %25 {strides = array<i32>} : memref<16x128xbf16, #tpu.memory_space<vmem>>, vector<16x128xbf16>,
    return
  }
  func.func @transform_0(%arg0: i32) -> (i32, i32) {
    %c0_i32 = arith.constant 0 : i32
    %c0_i32_0 = arith.constant 0 : i32
    return %arg0, %c0_i32 : i32, i32
  }
  func.func @transform_1(%arg0: i32) -> (i32, i32) {
    %c0_i32 = arith.constant 0 : i32
    %c0_i32_0 = arith.constant 0 : i32
    %c0_i32_1 = arith.constant 0 : i32
    return %c0_i32, %c0_i32_0 : i32, i32
  }
  func.func @transform_2(%arg0: i32) -> (i32, i32) {
    %c0_i32 = arith.constant 0 : i32
    %c0_i32_0 = arith.constant 0 : i32
    %c0_i32_1 = arith.constant 0 : i32
    return %c0_i32, %c0_i32_0 : i32, i32
  }
  func.func @transform_3(%arg0: i32) -> (i32, i32) {
    %c0_i32 = arith.constant 0 : i32
    %c0_i32_0 = arith.constant 0 : i32
    return %arg0, %c0_i32 : i32, i32
  }
}

</mosaic_0001>

<bundles_post_ra>
// kernel: tpu_custom_call.1
= control target key start
LH: loop header
LB: loop body
LE: loop exit
PB: predicated region body
PF: predicated region fallthrough
CT: control target
= control target key end

     0   :  { %8 = vsyncpa [#allocation3], 0  ;;  %s705_s0 = inlined_call_operand.hbm [shape: f32[32,128], index: 0, kind: input, shape index: {}]   ;;  %s706_s1 = inlined_call_operand.vmem [shape: f32[1,128], index: 1, kind: input, shape index: {}]   ;;  %s707_s2 = inlined_call_operand.vmem [shape: f32[1,128], index: 2, kind: input, shape index: {}]   ;;  %s708_s3 = inlined_call_operand.hbm [shape: bf16[32,128], index: 3, kind: output, shape index: {}]  }
   0x1   :  { %10 = vsyncpa [#allocation3 + $0x1], 0 }
   0x2   :  { %11 = vsyncpa [#allocation4], 0 }
   0x3   :  { %13 = vsyncpa [#allocation4 + $0x1], 0  ;;  %s536_s12 = smov 0   ;;  %s538_s13 = smov 0  }
   0x4   :  { %s540_s14 = smov 0   ;;  %s542_s15 = smov 0  }
   0x5 LB: > { %s557_s16 = sadd.s32 4294967295, %s508_s15   ;;  %s331_s17 = sadd.s32 4294967294, %s508_s15   ;;  %s508_s15 = sphi %s542_s15, %s721_s15   ;;  %s504_s14 = sphi %s540_s14, %s720_s14   ;;  %s500_s13 = sphi %s538_s13, %s719_s13   ;;  %s496_s12 = sphi %s536_s12, %s718_s12  }
   0x6   : > { %s561_s18 = sadd.s32 1, %s508_s15   ;;  %s26_s19 = sadd.s32 1, %s504_s14 }
   0x7   : > { %s23_s20 = ssub.s32 %s508_s15, %s561_s18  ;;  %p33_p0 = scmp.ne.s32.totalorder %s504_s14, %s500_s13 }
   0x8   : > { %p24_p1 = scmp.eq.s32.totalorder %s23_s20, 0  ;;  %p34_p2 = scmp.eq.s32.totalorder %s508_s15, 0 }
   0x9   : > { %p39_p3 = scmp.ne.s32.totalorder %s500_s13, %s496_s12  ;;  %p40_p4 = scmp.eq.s32.totalorder %s557_s16, 0 }
   0xa   : > { %s573_s21 = scalar_select %p24_p1, %s504_s14, %s26_s19  }
   0xb   : > { %p575_p5 = por %p34_p2, %p33_p0  ;;  %p579_p6 = por %p40_p4, %p39_p3 }
   0xc   : > { %p105_p7 = scmp.eq.s32.totalorder %s557_s16, 1  ;;  %p111_p8 = scmp.eq.s32.totalorder %s331_s17, 1 }
   0xd   : > { %p370_p10 = scmp.lt.s32.totalorder %s508_s15, 2  ;;  %s137_s26 = sand.u32 1, %s504_s14  }
   0xe   : > { %p586_p11 = por %p105_p7, %p33_p0  ;;  %p590_p12 = por %p111_p8, %p39_p3 }
   0xf   : > { %s349_s27 = sshll.u32 %s508_s15, 8  ;;  %s334_s28 = sshll.u32 %s137_s26, 4 }
  0x10   : > { %s712_s24 = scalar_select %p586_p11, 1, 0 }
  0x11   : > { %s713_s25 = scalar_select %p590_p12, 1, 0 }
  0x12   : > { %s599_s4 = scalar_lea.hbm %s705_s0, %s349_s27  ;;  %s141_s5 = scalar_lea.vmem [#allocation2], %s334_s28 }
  0x13   : > { %s148_s6 = sshll.u32 %s141_s5, 4  ;;  %p603_p13 = pnand %p370_p10, %p575_p5  ;;  %s607_s6 = int_to_ptr.vmem [resolvable:$true] %s148_s6 }
  0x14   : > { %s609_s8 = scalar_lea.sflag [#allocation3], %s137_s26  ;;  %s412_s9 = scalar_lea.hbm %s599_s4, 256 }
  0x15   : > { %p413_p0 = scmp.ne.s32.totalorder %s599_s4, %s412_s9  ;;  %p414_p1 = pneg %p603_p13 }
  0x16   : > { %s417_s17 = scalar_lea.hbm %s705_s0, 512  ;;  %p418_p4 = scmp.lt.u32.totalorder %s599_s4, %s705_s0 }
  0x17   : > { %p415_p2 = pnand %p414_p1, %p413_p0  ;;  %p419_p5 = scmp.lt.u32.totalorder %s417_s17, %s412_s9 }
  0x18   : > { %p421_p8 = scmp.lt.u32.totalorder %s412_s9, %s599_s4 }
  0x19   : > { %p416_p3 = pneg %p415_p2  ;;  %p420_p7 = por %p419_p5, %p418_p4 }
  0x1b   : > { %p422_p10 = por %p421_p8, %p420_p7 }
  0x1d   : > { %p423_p9 = pnand %p422_p10, %p416_p3 }
  0x1f   : > { %426 = shalt.err (!%p423_p9)
}
  0x20   : > { %s427_s22 = scalar_lea.vmem %s607_s6, 256  ;;  %s510_s26 = smov [#allocation2]  }
  0x21   : > { %p428_p0 = scmp.ne.s32.totalorder %s607_s6, %s427_s22  ;;  %s432_s27 = sshll.u32 %s510_s26, 4  ;;  %s433_s27 = int_to_ptr.vmem [resolvable:$false] %s432_s27 }
  0x22   : > { %s434_s28 = scalar_lea.vmem %s433_s27, 512  ;;  %p435_p11 = scmp.lt.s32.totalorder %s607_s6, %s433_s27 }
  0x23   : > { %p430_p2 = pnand %p428_p0, %p414_p1  ;;  %p436_p4 = scmp.lt.s32.totalorder %s434_s28, %s427_s22 }
  0x25   : > { %p431_p12 = pneg %p430_p2  ;;  %p437_p5 = por %p436_p4, %p435_p11 }
  0x27   : > { %p438_p7 = pnand %p437_p5, %p431_p12 }
  0x29   : > { %441 = shalt.err (!%p438_p7)
}
  0x2a   : > { %s511_s29 = smov 128   ;;  %s512_s30 = smov 8  }
  0x2b   : > { %365 = dma.hbm_to_vmem [thread:$0]  (!%p603_p13), %s599_s4, 256, %s607_s6, %s609_s8, %s511_s29, %s511_s29, %s512_s30  }
  0x2c   : > { %p337_p9 = scmp.ge.s32.totalorder %s508_s15, 1  ;;  %p156_p1 = scmp.lt.s32.totalorder %s508_s15, 3 }
  0x2e   : > { %p157_p3 = pnand %p337_p9, %p156_p1 }
  0x2f   : > { %s640_s5 = sand.u32 (!%p157_p3), 1, %s500_s13  }
  0x30   : > { %160 = sbr.rel (%p157_p3) target bundleno = 389 (0x185), region = 32  ;;  %s338_s9 = sshll.u32 (!%p157_p3), %s640_s5, 4 }
  0x31   : > { %s163_s10 = scalar_lea.sflag (!%p157_p3), [#allocation3], %s640_s5  ;;  %s166_s11 = scalar_lea.vmem (!%p157_p3), [#allocation2], %s338_s9 }
  0x37   : > { %487 = dma.done.wait (%p579_p6), %s163_s10, 256  }
  0x38   : > { %489 = vsyncadd (%p579_p6), %s163_s10, 4294967040  ;;  %v191_v0 = vld [vmem:[%s166_s11] sm:$0xff]  ;;  %v192_v1 = vld [vmem:[%s166_s11 + $0x8] sm:$0xff]  ;;  %s339_s23 = sshll.u32 %s640_s5, 3  ;;  %s352_s17 = sshll.u32 %s557_s16, 7 }
  0x39   : > { %193 = vadd.xlane.f32.xlu0 %v191_v0  ;;  %v340_v18 = vld [vmem:[%s706_s1] ss:$0 sm:$0xff]  ;;  %s188_s19 = scalar_lea.vmem [#allocation5], %s339_s23  ;;  %s659_s27 = scalar_lea.hbm %s708_s3, %s352_s17 }
  0x3a   : > { %v341_v22 = vld [vmem:[%s707_s2] ss:$0 sm:$0xff]  ;;  %s258_s20 = sshll.u32 %s188_s19, 4  ;;  %s245_s28 = scalar_lea.sflag [#allocation4], %s640_s5  ;;  %s661_s20 = int_to_ptr.vmem [resolvable:$true] %s258_s20 }
  0x3b   : > { %s442_s29 = scalar_lea.vmem %s661_s20, 128  ;;  %p715_p11 = scmp.ne.s32.totalorder %s712_s24, 0 }
  0x3c   : > { %p443_p6 = scmp.ne.s32.totalorder %s661_s20, %s442_s29  ;;  %s513_s16 = smov [#allocation5]  }
  0x3d   : > { %195 = vadd.xlane.f32.xlu0 %v192_v1  ;;  %s446_s30 = sshll.u32 %s513_s16, 4  ;;  %s447_s30 = int_to_ptr.vmem [resolvable:$false] %s446_s30 }
  0x3e   : > { %p444_p12 = pnand %p443_p6, %p715_p11  ;;  %s448_s9 = scalar_lea.vmem %s447_s30, 256 }
  0x3f   : > { %p449_p8 = scmp.lt.s32.totalorder %s661_s20, %s447_s30  ;;  %p450_p10 = scmp.lt.s32.totalorder %s448_s9, %s442_s29 }
  0x40   : > { %p445_p13 = pneg %p444_p12 }
  0x41   : > { %p451_p0 = por %p450_p10, %p449_p8 }
  0x43   : > { %p452_p2 = pnand %p451_p0, %p445_p13 }
  0xc6   : > { %v194_v2 = vpop.xlane.xlu0 %193 }
  0xc7   : > { %v198_v3 = vmul.f32 0.0078125, %v194_v2 }
  0xc9   : > { %v200_v4 = vsub.f32 %v191_v0, %v198_v3 }
  0xca   : > { %v196_v5 = vpop.xlane.xlu0 %195 }
  0xcb   : > { %v199_v6 = vmul.f32 0.0078125, %v196_v5  ;;  %v202_v7 = vmul.f32 %v200_v4, %v200_v4 }
  0xcd   : > { %v201_v8 = vsub.f32 %v192_v1, %v199_v6  ;;  %204 = vadd.xlane.f32.xlu1 %v202_v7 }
  0xcf   : > { %v203_v9 = vmul.f32 %v201_v8, %v201_v8 }
  0xd1   : > { %206 = vadd.xlane.f32.xlu1 %v203_v9 }
 0x15a   : > { %v205_v10 = vpop.xlane.xlu1 %204 }
 0x15b   : > { %v208_v11 = vmul.f32 0.0078125, %v205_v10 }
 0x15d   : > { %v210_v12 = vadd.f32 1e-12, %v208_v11 }
 0x15e   : > { %v207_v13 = vpop.xlane.xlu1 %206 }
 0x15f   : > { %408 = vrsqrt.f32 %v210_v12  ;;  %v209_v14 = vmul.f32 0.0078125, %v207_v13 }
 0x161   : > { %v211_v15 = vadd.f32 1e-12, %v209_v14 }
 0x163   : > { %410 = vrsqrt.f32 %v211_v15 }
 0x169   : > { %v409_v16 = vpop.eup %408 }
 0x16a   : > { %v214_v17 = vmul.f32 %v409_v16, %v200_v4 }
 0x16c   : > { %v223_v20 = vmul.f32 %v340_v18, %v214_v17 }
 0x16d   : > { %v411_v19 = vpop.eup %410 }
 0x16e   : > { %v215_v21 = vmul.f32 %v411_v19, %v201_v8  ;;  %v232_v24 = vadd.f32 %v341_v22, %v223_v20 }
 0x170   : > { %v224_v23 = vmul.f32 %v340_v18, %v215_v21 }
 0x172   : > { %v233_v25 = vadd.f32 %v341_v22, %v224_v23 }
 0x174   : > { %v356_v26 = vpack.c.bf16 %v233_v25, %v232_v24 }
 0x176   : > { %357 = vst [vmem:[%s188_s19] sm:$0xff] %v356_v26  }
 0x177   : > { %455 = shalt.err (!%p452_p2)
}
 0x178   : > { %s456_s10 = scalar_lea.hbm %s659_s27, 128  ;;  %s460_s4 = scalar_lea.hbm %s708_s3, 256 }
 0x179   : > { %p457_p4 = scmp.ne.s32.totalorder %s659_s27, %s456_s10  ;;  %p461_p9 = scmp.lt.u32.totalorder %s659_s27, %s708_s3 }
 0x17a   : > { %p462_p1 = scmp.lt.u32.totalorder %s460_s4, %s456_s10  ;;  %p464_p6 = scmp.lt.u32.totalorder %s456_s10, %s659_s27 }
 0x17b   : > { %p458_p5 = pnand %p457_p4, %p715_p11 }
 0x17c   : > { %p463_p3 = por %p462_p1, %p461_p9 }
 0x17d   : > { %p459_p7 = pneg %p458_p5 }
 0x17e   : > { %p465_p12 = por %p464_p6, %p463_p3 }
 0x180   : > { %p466_p13 = pnand %p465_p12, %p459_p7 }
 0x182   : > { %469 = shalt.err (!%p466_p13)
}
 0x183   : > { %s514_s8 = smov 64   ;;  %s515_s17 = smov 4  }
 0x184   : > { %360 = dma.vmem_to_hbm [thread:$0]  (%p715_p11), %s661_s20, 128, %s659_s27, %s245_s28, %s514_s8, %s514_s8, %s515_s17  }
 0x185 PF: > { %s273_s19 = sand.u32 1, %s496_s12   ;;  %p716_p8 = scmp.ne.s32.totalorder %s713_s25, 0 }
 0x186   : > { %p717_p10 = scmp.ge.s32.totalorder %s508_s15, 2  ;;  %s274_s22 = scalar_lea.sflag [#allocation4], %s273_s19 }
 0x188   : > { %p367_p0 = pnand %p717_p10, %p716_p8 }
 0x18a   : > { %491 = dma.done.wait (!%p367_p0), %s274_s22, 128  }
 0x18b   : > { %493 = vsyncadd (!%p367_p0), %s274_s22, 4294967168  ;;  %p16_p2 = scmp.ge.s32.totalorder %s561_s18, 4   ;;  %s718_s12 = smov %s500_s13 }
 0x18c   : > { %s719_s13 = smov %s504_s14  ;;  %s720_s14 = smov %s573_s21 }
 0x18d   : > { %s721_s15 = smov %s561_s18  ;;  %18 = sbr.rel (!%p16_p2) target bundleno = 5 (0x5), region = 77 }
 0x194   :  { %279 = vsyncpa [#allocation3], 1 }
 0x195   :  { %281 = vsyncpa [#allocation3 + $0x1], 1 }
 0x196   :  { %282 = vsyncpa [#allocation4], 1 }
 0x197   :  { %284 = vsyncpa [#allocation4 + $0x1], 1 }

</bundles_post_ra>
